<compile_context>
chip_gen: v5e
topology: v5e:2x2
jax: 0.10.0
libtpu: 0.0.40
codegen_flags: <defaults>
</compile_context>

<pallas_src>
import jax
import jax.numpy as jnp
from jax.experimental import pallas as pl
from jax.experimental.pallas import tpu as pltpu


def _round_up(x, m):
    return ((x + m - 1) // m) * m


def _embedding_gather_kernel(idx_ref, table_ref, out_ref, acc_ref):
    # idx_ref   : (TILE_N, 1)      int32 global indices for this row tile
    # table_ref : (V_CHUNK, D)     one vocab chunk of the embedding table
    # out_ref   : (TILE_N, D)      gathered rows (written on the last chunk)
    # acc_ref   : (TILE_N, D) f32  accumulator, resident across vocab chunks
    j = pl.program_id(1)

    @pl.when(j == 0)
    def _():
        acc_ref[...] = jnp.zeros_like(acc_ref)

    idx = idx_ref[...]                                   # (TILE_N, 1)
    tile_n = idx.shape[0]
    v_chunk = table_ref.shape[0]

    # One-hot gather on the MXU: onehot[t, v] = (global_col(v) == idx[t]).
    col = jax.lax.broadcasted_iota(jnp.int32, (tile_n, v_chunk), 1)
    col = col + j * v_chunk                              # global vocab position
    onehot = (col == idx).astype(table_ref.dtype)        # (TILE_N, V_CHUNK)

    acc_ref[...] += jnp.dot(
        onehot, table_ref[...], preferred_element_type=jnp.float32
    )

    @pl.when(j == pl.num_programs(1) - 1)
    def _():
        out_ref[...] = acc_ref[...].astype(out_ref.dtype)


def ticker_embedding_pallas(ticker_indices, embedding_table, *,
                            tile_n=512, vocab_chunk=1024):
    """Equivalent of nn.Embedding(num_tickers, D)(ticker_indices)."""
    num_tickers, emb_dim = embedding_table.shape
    dtype = embedding_table.dtype
    elt = jnp.dtype(dtype).itemsize

    idx_shape = ticker_indices.shape
    flat_idx = ticker_indices.reshape(-1).astype(jnp.int32)
    n = flat_idx.shape[0]

    # Row tile: large for realistic N, shrunk (to a multiple of 8) for tiny N
    # so a 16-row lookup is not padded out to hundreds of rows.
    tile = min(tile_n, _round_up(max(n, 1), 8))
    n_pad = _round_up(n, tile)
    if n_pad != n:
        flat_idx = jnp.pad(flat_idx, (0, n_pad - n))     # pad with index 0 (valid)
    idx_col = flat_idx.reshape(n_pad, 1)

    # Vocab chunking: small tables stay fully resident (single chunk, no
    # padding).  Large tables are streamed chunk-by-chunk; chunks must be a
    # multiple of 8 sublanes, so pad the vocab axis with zero rows (never
    # addressed by valid indices).
    if num_tickers <= vocab_chunk:
        v_chunk = num_tickers
        table = embedding_table
        v_pad = num_tickers
    else:
        v_chunk = _round_up(vocab_chunk, 8)
        v_pad = _round_up(num_tickers, v_chunk)
        table = embedding_table
        if v_pad != num_tickers:
            table = jnp.pad(embedding_table, ((0, v_pad - num_tickers), (0, 0)))

    grid = (n_pad // tile, v_pad // v_chunk)

    # VMEM budget (double-buffered blocks + acc scratch + one-hot temporaries).
    idx_block_bytes = tile * 128 * 4                     # (tile,1) pads to 128 lanes
    table_block_bytes = v_chunk * emb_dim * elt
    out_block_bytes = tile * max(emb_dim, 128) * elt
    onehot_bytes = tile * max(v_chunk, 128) * (4 + elt)  # iota + one-hot
    vmem_needed = (2 * (idx_block_bytes + table_block_bytes + out_block_bytes)
                   + tile * max(emb_dim, 128) * 4 + onehot_bytes + (1 << 20))
    vmem_limit = (
        min(vmem_needed, 64 * 1024 * 1024) if vmem_needed > (32 << 20) else None
    )

    cost = pl.CostEstimate(
        flops=2 * n_pad * v_pad * emb_dim,
        transcendentals=0,
        bytes_accessed=(n_pad * emb_dim * elt
                        + grid[0] * v_pad * emb_dim * elt
                        + n_pad * 4),
    )

    out = pl.pallas_call(
        _embedding_gather_kernel,
        out_shape=jax.ShapeDtypeStruct((n_pad, emb_dim), dtype),
        grid_spec=pltpu.PrefetchScalarGridSpec(
            num_scalar_prefetch=0,
            grid=grid,
            in_specs=[
                # Index tile for this row-tile; constant across vocab chunks.
                pl.BlockSpec((tile, 1), lambda i, j: (i, 0)),
                # Streaming vocab chunk of the table.
                pl.BlockSpec((v_chunk, emb_dim), lambda i, j: (j, 0)),
            ],
            out_specs=pl.BlockSpec((tile, emb_dim), lambda i, j: (i, 0)),
            scratch_shapes=[pltpu.VMEM((tile, emb_dim), jnp.float32)],
        ),
        compiler_params=pltpu.CompilerParams(
            dimension_semantics=("parallel", "arbitrary"),
            vmem_limit_bytes=vmem_limit,
        ),
        cost_estimate=cost,
    )(idx_col, table)

    return out[:n].reshape(idx_shape + (emb_dim,))


def make_ticker_embedding_params(key, num_tickers, embedding_dim=64):
    """Deterministic xavier_uniform init, matching nn.init.xavier_uniform_."""
    bound = (6.0 / (num_tickers + embedding_dim)) ** 0.5
    return jax.random.uniform(
        key, (num_tickers, embedding_dim), dtype=jnp.float32,
        minval=-bound, maxval=bound,
    )


if __name__ == "__main__":
    key = jax.random.PRNGKey(0)
    k_t1, k_i1, k_t2, k_i2 = jax.random.split(key, 4)

    # --- Small case matching the module's default shapes ------------------
    num_tickers = 16
    embedding_dim = 64
    batch, seq = 2, 8

    table = make_ticker_embedding_params(k_t1, num_tickers, embedding_dim)
    ticker_indices = jax.random.randint(
        k_i1, (batch, seq), minval=0, maxval=num_tickers, dtype=jnp.int32
    )

    out = ticker_embedding_pallas(ticker_indices, table)
    out = jax.block_until_ready(out)

    ref = jnp.take(table, ticker_indices, axis=0)
    assert out.shape == (batch, seq, embedding_dim), out.shape
    assert out.dtype == jnp.float32, out.dtype
    assert jnp.allclose(out, ref), "mismatch vs reference gather (small case)"

    # --- Non-aligned case exercising row tiling + vocab chunking ----------
    num_tickers2 = 37           # not a multiple of 8
    batch2, seq2 = 4, 300       # n = 1200 -> padded to 1536, row grid = 3

    table2 = make_ticker_embedding_params(k_t2, num_tickers2, embedding_dim)
    idx2 = jax.random.randint(
        k_i2, (batch2, seq2), minval=0, maxval=num_tickers2, dtype=jnp.int32
    )

    # vocab_chunk=16 forces the chunked/accumulating path (3 vocab chunks).
    out2 = ticker_embedding_pallas(idx2, table2, vocab_chunk=16)
    out2 = jax.block_until_ready(out2)
    ref2 = jnp.take(table2, idx2, axis=0)
    assert out2.shape == (batch2, seq2, embedding_dim), out2.shape
    assert jnp.allclose(out2, ref2), "mismatch vs reference gather (chunked case)"

    print("KERNEL_OK")
</pallas_src>

<mosaic_0001>
module attributes {stable_mosaic.version = 11 : i64} {
  func.func @_embedding_gather_kernel(%arg0: i32, %arg1: i32, %arg2: memref<16x1xi32, #tpu.memory_space<vmem>>, %arg3: memref<16x64xf32, #tpu.memory_space<vmem>>, %arg4: memref<16x64xf32, #tpu.memory_space<vmem>>, %arg5: memref<16x64xf32, #tpu.memory_space<vmem>>) attributes {dimension_semantics = [#tpu.dimension_semantics<parallel>, #tpu.dimension_semantics<arbitrary>], iteration_bounds = array<i64: 1, 1>, scalar_prefetch = 0 : i64, scratch_operands = 1 : i64, tpu.core_type = #tpu.core_type<tc>, window_params = [{transform_indices = @transform_0, window_bounds = array<i64: 16, 1>}, {transform_indices = @transform_1, window_bounds = array<i64: 16, 64>}, {transform_indices = @transform_2, window_bounds = array<i64: 16, 64>}]} {
    %c0_i32 = arith.constant 0 : i32
    %0 = arith.cmpi eq, %arg1, %c0_i32 : i32
    %1 = arith.extui %0 : i1 to i32
    %c0_i32_0 = arith.constant 0 : i32
    %2 = arith.cmpi ne, %1, %c0_i32_0 : i32
    scf.if %2 {
      %cst_10 = arith.constant 0.000000e+00 : f32
      %20 = vector.broadcast %cst_10 : f32 to vector<16x64xf32>
      %c0_11 = arith.constant 0 : index
      %c0_12 = arith.constant 0 : index
      %21 = vector.load %arg5[%c0_11, %c0_12] : memref<16x64xf32, #tpu.memory_space<vmem>>, vector<16x64xf32>
      tpu.vector_store %arg5[%c0_11, %c0_12], %20 {strides = array<i32>} : memref<16x64xf32, #tpu.memory_space<vmem>>, vector<16x64xf32>,
    } else {
    }
    %c0 = arith.constant 0 : index
    %c0_1 = arith.constant 0 : index
    %3 = vector.load %arg2[%c0, %c0_1] : memref<16x1xi32, #tpu.memory_space<vmem>>, vector<16x1xi32>
    %4 = tpu.iota {dimensions = array<i32: 1>} : vector<16x16xi32>
    %c16_i32 = arith.constant 16 : i32
    %5 = arith.muli %arg1, %c16_i32 : i32
    %6 = vector.broadcast %5 : i32 to vector<16x16xi32>
    %7 = arith.addi %4, %6 : vector<16x16xi32>
    %8 = vector.broadcast %3 : vector<16x1xi32> to vector<16x16xi32>
    %9 = arith.cmpi eq, %7, %8 : vector<16x16xi32>
    %10 = arith.extui %9 : vector<16x16xi1> to vector<16x16xi32>
    %11 = arith.sitofp %10 : vector<16x16xi32> to vector<16x16xf32>
    %c0_2 = arith.constant 0 : index
    %c0_3 = arith.constant 0 : index
    %12 = vector.load %arg5[%c0_2, %c0_3] : memref<16x64xf32, #tpu.memory_space<vmem>>, vector<16x64xf32>
    %c0_4 = arith.constant 0 : index
    %c0_5 = arith.constant 0 : index
    %13 = vector.load %arg3[%c0_4, %c0_5] : memref<16x64xf32, #tpu.memory_space<vmem>>, vector<16x64xf32>
    %cst = arith.constant dense<0.000000e+00> : vector<16x64xf32>
    %14 = tpu.matmul %11, %13, %cst {dimension_numbers = #tpu.dot_dimension_numbers<[1], [0], [0], [1], [0, 0, 1, 1], [], []>} : vector<16x16xf32>, vector<16x64xf32>, vector<16x64xf32> -> vector<16x64xf32>
    %15 = arith.addf %12, %14 : vector<16x64xf32>
    %c0_6 = arith.constant 0 : index
    %c0_7 = arith.constant 0 : index
    %16 = vector.load %arg5[%c0_6, %c0_7] : memref<16x64xf32, #tpu.memory_space<vmem>>, vector<16x64xf32>
    tpu.vector_store %arg5[%c0_6, %c0_7], %15 {strides = array<i32>} : memref<16x64xf32, #tpu.memory_space<vmem>>, vector<16x64xf32>,
    %c0_i32_8 = arith.constant 0 : i32
    %17 = arith.cmpi eq, %arg1, %c0_i32_8 : i32
    %18 = arith.extui %17 : i1 to i32
    %c0_i32_9 = arith.constant 0 : i32
    %19 = arith.cmpi ne, %18, %c0_i32_9 : i32
    scf.if %19 {
      %c0_10 = arith.constant 0 : index
      %c0_11 = arith.constant 0 : index
      %20 = vector.load %arg5[%c0_10, %c0_11] : memref<16x64xf32, #tpu.memory_space<vmem>>, vector<16x64xf32>
      %c0_12 = arith.constant 0 : index
      %c0_13 = arith.constant 0 : index
      %21 = vector.load %arg4[%c0_12, %c0_13] : memref<16x64xf32, #tpu.memory_space<vmem>>, vector<16x64xf32>
      tpu.vector_store %arg4[%c0_12, %c0_13], %20 {strides = array<i32>} : memref<16x64xf32, #tpu.memory_space<vmem>>, vector<16x64xf32>,
    } else {
    }
    return
  }
  func.func @transform_0(%arg0: i32, %arg1: i32) -> (i32, i32) {
    %c0_i32 = arith.constant 0 : i32
    %c0_i32_0 = arith.constant 0 : i32
    return %arg0, %c0_i32 : i32, i32
  }
  func.func @transform_1(%arg0: i32, %arg1: i32) -> (i32, i32) {
    %c0_i32 = arith.constant 0 : i32
    %c0_i32_0 = arith.constant 0 : i32
    return %arg1, %c0_i32 : i32, i32
  }
  func.func @transform_2(%arg0: i32, %arg1: i32) -> (i32, i32) {
    %c0_i32 = arith.constant 0 : i32
    %c0_i32_0 = arith.constant 0 : i32
    return %arg0, %c0_i32 : i32, i32
  }
}

</mosaic_0001>

<bundles_post_ra>
// kernel: tpu_custom_call.1
= control target key start
LH: loop header
LB: loop body
LE: loop exit
PB: predicated region body
PF: predicated region fallthrough
CT: control target
= control target key end

     0   :  { %v140_v2 = vmov 0   ;;  %s181_s0 = inlined_call_operand.vmem [shape: s32[16,1], index: 0, kind: input, shape index: {}]   ;;  %s182_s1 = inlined_call_operand.vmem [shape: f32[16,64], index: 1, kind: input, shape index: {}]   ;;  %s183_s2 = inlined_call_operand.hbm [shape: f32[16,64], index: 2, kind: output, shape index: {}]  }
   0x1   :  { %v19_v0 = vld [vmem:[%s181_s0] sm:$0xff]  ;;  %v41_v1 = vld [vmem:[%s182_s1 + $0x8] sm:$0xff]  ;;  %113 = vset.pattern.permute.xlu0 %v140_v2 }
   0x2   :  { %63 = vmatpush.msra.mxu0 %v41_v1 }
   0x3   :  { %7 = vsyncpa [#allocation4], 0  ;;  %27 = vperm.xlu0 %113, %v19_v0   ;;  %106 = vmatpush.msra.mxu1 %v41_v1  ;;  %v20_v3 = vld [vmem:[%s181_s0 + $0x8] sm:$0xff]  ;;  %v40_v4 = vld [vmem:[%s182_s1] sm:$0xff]  ;;  %vm16_vm0 = vcmask 523264   ;;  %v141_v5 = vmov 0.0   ;;  %v21_v6 = vlaneseq }
   0x4   :  { %64 = vmatpush.msra.mxu0 %v40_v4  ;;  %17 = vst.msk [vmem:[#allocation2] sm:$0xff] %vm16_vm0, %v141_v5  ;;  %vm42_vm1 = vcmask 130048   ;;  %s142_s0 = smov [#allocation3]   ;;  %s90_s19 = sshll.u32 %s183_s2, 4  ;;  %s91_s19 = int_to_ptr.hbm [resolvable:$true] %s90_s19 }
   0x5   :  { %107 = vmatpush.msra.mxu1 %v40_v4  ;;  %18 = vst.msk [vmem:[#allocation2 + $0x8] sm:$0xff] %vm16_vm0, %v141_v5  ;;  %v22_v7 = vand.u32 127, %v21_v6  ;;  %s88_s1 = sshll.u32 %s142_s0, 4  ;;  %s143_s20 = smov 128   ;;  %s89_s1 = int_to_ptr.vmem [resolvable:$true] %s88_s1 }
   0x6   :  { %s144_s21 = smov 8  }
   0xb   :  { %30 = vperm.xlu0 %113, %v20_v3   ;;  %v38_v12 = vld [vmem:[#allocation2] sm:$0xff] }
   0xc   :  { %v39_v15 = vld [vmem:[#allocation2 + $0x8] sm:$0xff] }
  0x75   :  { %v28_v8 = vpop.permute.xlu0 %27 }
  0x76   :  { %vm32_vm2 = vcmp.eq.s32.totalorder %v22_v7, %v28_v8 }
  0x77   :  { %v102_v9 = vsel %vm32_vm2, 1.0, %v141_v5 }
  0x78   :  { %104 = vmatmul.msk.f32.vlgmr.msra.gmra.mxu0 %vm42_vm1, %v102_v9 }
  0x7d   :  { %v31_v10 = vpop.permute.xlu0 %30 }
  0x7e   :  { %vm33_vm3 = vcmp.eq.s32.totalorder %v22_v7, %v31_v10 }
  0x7f   :  { %v103_v11 = vsel %vm33_vm3, 1.0, %v141_v5 }
  0x80   :  { %105 = vmatmul.msk.f32.vlgmr.msra.gmra.mxu1 %vm42_vm1, %v103_v11 }
  0xf5   :  { %v66_v13 = vpop.f32.mrf.mxu0 }
  0xf6   :  { %v72_v14 = vadd.f32 %v66_v13, %v38_v12 }
  0xf8   :  { %75 = vst.msk [vmem:[#allocation2] sm:$0xff] %vm16_vm0, %v72_v14 }
  0xfd   :  { %v69_v16 = vpop.f32.mrf.mxu1 }
  0xfe   :  { %v73_v17 = vadd.f32 %v69_v16, %v39_v15 }
  0xff   :  { %v80_v18 = vld [vmem:[#allocation2] sm:$0xff] }
 0x100   :  { %76 = vst.msk [vmem:[#allocation2 + $0x8] sm:$0xff] %vm16_vm0, %v73_v17 }
 0x101   :  { %82 = vst.msk [vmem:[#allocation3] sm:$0xff] %vm16_vm0, %v80_v18 }
 0x107   :  { %v81_v19 = vld [vmem:[#allocation2 + $0x8] sm:$0xff] }
 0x108   :  { %83 = vst.msk [vmem:[#allocation3 + $0x8] sm:$0xff] %vm16_vm0, %v81_v19 }
 0x109   :  { %96 = dma.vmem_to_hbm [thread:$0]  %s89_s1, 256, %s91_s19, [#allocation4], %s143_s20, %s143_s20, %s144_s21  }
 0x10a   :  { %138 = dma.done.wait [#allocation4], 256  }
 0x10b   :  { %139 = vsyncadd [#allocation4], 4294967040 }
 0x10c   :  { %101 = vsyncpa [#allocation4], 1 }

</bundles_post_ra>
